<compile_context>
chip_gen: v5e
topology: v5e:2x2
jax: 0.10.0
libtpu: 0.0.40
codegen_flags: <defaults>
</compile_context>

<pallas_src>
import math
import functools

import jax
import jax.numpy as jnp
from jax import lax
from jax.experimental import pallas as pl
from jax.experimental.pallas import tpu as pltpu


def _pick_tq_tile(tq, cap=256):
    """Largest sublane-friendly divisor of Tq that is <= cap (or Tq itself)."""
    if tq <= cap:
        return tq
    for t in range(cap, 0, -1):
        if tq % t == 0 and t % 8 == 0:
            return t
    return tq  # awkward (e.g. prime) Tq: fall back to the whole axis


def _make_kernel(tq_tile, scale, masked, return_weights):
    def kernel(*refs):
        if masked:
            vl_ref, q_ref, k_ref, v_ref = refs[0], refs[1], refs[2], refs[3]
            out_refs = refs[4:]
        else:
            q_ref, k_ref, v_ref = refs[0], refs[1], refs[2]
            out_refs = refs[3:]
        out_ref = out_refs[0]

        qi = pl.program_id(1)

        # Fold 1/sqrt(D) into Q: one VPU pass over (Bb, TQ, D) instead of (Bb, TQ, Tk).
        q = q_ref[...] * jnp.asarray(scale, dtype=q_ref.dtype)

        # Batched Q @ K^T: contract last dims directly (no explicit transpose),
        # fp32 accumulation on the MXU.
        scores = lax.dot_general(
            q, k_ref[...],
            dimension_numbers=(((2,), (2,)), ((0,), (0,))),
            preferred_element_type=jnp.float32,
        )  # (Bb, TQ_TILE, Tk) fp32

        if masked:
            # Reference semantics: mask *query rows* with index >= valid_len.
            # iota is offset by the Tq-tile position so tiling stays correct.
            vl = vl_ref[...]  # (Bb, 1, 1) int32
            row_ids = (lax.broadcasted_iota(jnp.int32, scores.shape, 1)
                       + qi * tq_tile)
            scores = jnp.where(row_ids < vl, scores, jnp.float32(-1000000.0))

        # Softmax over the key axis, fp32 throughout (v5e has no bf16 VPU/EUP).
        m = jnp.max(scores, axis=-1, keepdims=True)
        e = jnp.exp(scores - m)
        # NOTE: the reciprocal is over only (Bb, TQ_TILE, 1) elements, so the
        # exact version costs nothing measurable; approx=True would only loosen
        # the weights tolerance.
        w = e * pl.reciprocal(jnp.sum(e, axis=-1, keepdims=True), approx=False)

        if return_weights:
            w_ref = out_refs[1]
            w_ref[...] = w.astype(w_ref.dtype)

        # output = attention_weights @ V  -> (Bb, TQ_TILE, Dv)
        out_ref[...] = lax.dot_general(
            w.astype(v_ref.dtype), v_ref[...],
            dimension_numbers=(((2,), (1,)), ((0,), (0,))),
            preferred_element_type=jnp.float32,
        ).astype(out_ref.dtype)

    return kernel


@functools.partial(jax.jit, static_argnames=("return_weights",))
def dot_product_attention(queries, keys, values, valid_lens=None, *,
                          return_weights=True):
    """queries (B,Tq,D), keys (B,Tk,D), values (B,Tk,Dv)
    -> (output (B,Tq,Dv), weights (B,Tq,Tk)) if return_weights else output."""
    B, Tq, D = queries.shape
    _, Tk, Dv = values.shape
    masked = valid_lens is not None

    out_dtype = queries.dtype
    w_dtype = queries.dtype
    in_itemsize = jnp.dtype(queries.dtype).itemsize

    tq_tile = _pick_tq_tile(Tq)

    def step_bytes(bb):
        b = bb * (tq_tile * D + Tk * D + Tk * Dv + tq_tile * Dv) * in_itemsize
        b += bb * tq_tile * Tk * max(4, jnp.dtype(w_dtype).itemsize)  # scores/weights
        if masked:
            b += bb * 4
        return b

    # Pack several batch elements per grid step for small shapes, while keeping
    # the double-buffered footprint comfortably under the scoped-VMEM budget
    # (v7x has only 64 MiB physical VMEM per TC).
    budget = 12 * 1024 * 1024
    bb = 1
    bb_cap = max(1, min(B, max(1, 1024 // max(1, tq_tile))))
    for cand in range(bb_cap, 0, -1):
        if B % cand == 0 and 2 * step_bytes(cand) <= budget:
            bb = cand
            break

    grid = (B // bb, Tq // tq_tile)

    in_specs = []
    args = []
    if masked:
        vl3 = valid_lens.astype(jnp.int32).reshape(B, 1, 1)
        in_specs.append(pl.BlockSpec((bb, 1, 1), lambda bi, qi: (bi, 0, 0)))
        args.append(vl3)
    in_specs += [
        pl.BlockSpec((bb, tq_tile, D), lambda bi, qi: (bi, qi, 0)),
        pl.BlockSpec((bb, Tk, D), lambda bi, qi: (bi, 0, 0)),   # resident across qi
        pl.BlockSpec((bb, Tk, Dv), lambda bi, qi: (bi, 0, 0)),  # resident across qi
    ]
    args += [queries, keys, values]

    if return_weights:
        out_shape = (jax.ShapeDtypeStruct((B, Tq, Dv), out_dtype),
                     jax.ShapeDtypeStruct((B, Tq, Tk), w_dtype))
        out_specs = (pl.BlockSpec((bb, tq_tile, Dv), lambda bi, qi: (bi, qi, 0)),
                     pl.BlockSpec((bb, tq_tile, Tk), lambda bi, qi: (bi, qi, 0)))
    else:
        out_shape = jax.ShapeDtypeStruct((B, Tq, Dv), out_dtype)
        out_specs = pl.BlockSpec((bb, tq_tile, Dv), lambda bi, qi: (bi, qi, 0))

    bytes_accessed = (
        (queries.size + keys.size + values.size) * in_itemsize
        + B * Tq * Dv * jnp.dtype(out_dtype).itemsize
        + (B * Tq * Tk * jnp.dtype(w_dtype).itemsize if return_weights else 0)
        + (B * 4 if masked else 0)
    )
    cost = pl.CostEstimate(
        flops=int(2 * B * Tq * Tk * (D + Dv)),
        transcendentals=int(B * Tq * Tk),
        bytes_accessed=int(bytes_accessed),
    )

    vmem_limit = int(min(64 * 1024 * 1024,
                         max(32 * 1024 * 1024, 4 * step_bytes(bb))))

    kernel = _make_kernel(tq_tile, 1.0 / math.sqrt(D), masked, return_weights)

    # TODO(synk): for lane-sparse shapes (Tk or Dv < 128) a wrapper-level pad of
    # the last dim to 128 would avoid masked partial stores; skipped here to keep
    # the interface identical to the reference module.
    return pl.pallas_call(
        kernel,
        out_shape=out_shape,
        grid=grid,
        in_specs=in_specs,
        out_specs=out_specs,
        compiler_params=pltpu.CompilerParams(
            dimension_semantics=("parallel", "parallel"),
            vmem_limit_bytes=vmem_limit,
        ),
        cost_estimate=cost,
    )(*args)


def _reference(queries, keys, values, valid_lens=None):
    """Pure-JAX reference mirroring the PyTorch module exactly."""
    d = queries.shape[-1]
    scores = jnp.einsum("bqd,bkd->bqk", queries, keys) / math.sqrt(d)
    if valid_lens is not None:
        Tq = scores.shape[1]
        row_ids = jnp.arange(Tq)[None, :]                 # (1, Tq)
        mask = row_ids < valid_lens[:, None]              # (B, Tq)
        scores = jnp.where(mask[:, :, None], scores, -1000000.0)
    w = jax.nn.softmax(scores, axis=-1)
    return jnp.einsum("bqk,bkd->bqd", w, values), w


if __name__ == "__main__":
    key = jax.random.PRNGKey(0)
    B, Tq, Tk, D, Dv = 2, 8, 8, 32, 32

    kq, kk, kv = jax.random.split(key, 3)
    queries = jax.random.normal(kq, (B, Tq, D), dtype=jnp.float32)
    keys = jax.random.normal(kk, (B, Tk, D), dtype=jnp.float32)
    values = jax.random.normal(kv, (B, Tk, Dv), dtype=jnp.float32)
    valid_lens = jnp.array([3, 6], dtype=jnp.int32)

    # masked case
    out, weights = dot_product_attention(queries, keys, values, valid_lens)
    jax.block_until_ready(out)
    ref_out, ref_w = _reference(queries, keys, values, valid_lens)
    assert jnp.allclose(out, ref_out, atol=1e-4, rtol=1e-4), "masked output mismatch"
    assert jnp.allclose(weights, ref_w, atol=1e-5, rtol=1e-5), "masked weights mismatch"

    # unmasked case (valid_lens=None)
    out2, w2 = dot_product_attention(queries, keys, values, None)
    jax.block_until_ready(out2)
    ref_out2, ref_w2 = _reference(queries, keys, values, None)
    assert jnp.allclose(out2, ref_out2, atol=1e-4, rtol=1e-4), "unmasked output mismatch"
    assert jnp.allclose(w2, ref_w2, atol=1e-5, rtol=1e-5), "unmasked weights mismatch"

    # weights-free fast path (drops the B*Tq*Tk HBM writeback entirely)
    out3 = dot_product_attention(queries, keys, values, valid_lens,
                                 return_weights=False)
    jax.block_until_ready(out3)
    assert jnp.allclose(out3, ref_out, atol=1e-4, rtol=1e-4), "no-weights output mismatch"

    print("KERNEL_OK")
</pallas_src>

<mosaic_0001>
module attributes {stable_mosaic.version = 11 : i64} {
  func.func @kernel(%arg0: i32, %arg1: i32, %arg2: memref<2x1x1xi32, #tpu.memory_space<vmem>>, %arg3: memref<2x8x32xf32, #tpu.memory_space<vmem>>, %arg4: memref<2x8x32xf32, #tpu.memory_space<vmem>>, %arg5: memref<2x8x32xf32, #tpu.memory_space<vmem>>, %arg6: memref<2x8x32xf32, #tpu.memory_space<vmem>>, %arg7: memref<2x8x8xf32, #tpu.memory_space<vmem>>) attributes {dimension_semantics = [#tpu.dimension_semantics<parallel>, #tpu.dimension_semantics<parallel>], iteration_bounds = array<i64: 1, 1>, scalar_prefetch = 0 : i64, scratch_operands = 0 : i64, tpu.core_type = #tpu.core_type<tc>, window_params = [{transform_indices = @transform_0, window_bounds = array<i64: 2, 1, 1>}, {transform_indices = @transform_1, window_bounds = array<i64: 2, 8, 32>}, {transform_indices = @transform_2, window_bounds = array<i64: 2, 8, 32>}, {transform_indices = @transform_3, window_bounds = array<i64: 2, 8, 32>}, {transform_indices = @transform_4, window_bounds = array<i64: 2, 8, 32>}, {transform_indices = @transform_5, window_bounds = array<i64: 2, 8, 8>}]} {
    %c0 = arith.constant 0 : index
    %c0_0 = arith.constant 0 : index
    %c0_1 = arith.constant 0 : index
    %0 = vector.load %arg3[%c0, %c0_0, %c0_1] : memref<2x8x32xf32, #tpu.memory_space<vmem>>, vector<2x8x32xf32>
    %cst = arith.constant 0.176776692 : f32
    %1 = vector.broadcast %cst : f32 to vector<2x8x32xf32>
    %2 = arith.mulf %0, %1 : vector<2x8x32xf32>
    %c0_2 = arith.constant 0 : index
    %c0_3 = arith.constant 0 : index
    %c0_4 = arith.constant 0 : index
    %3 = vector.load %arg4[%c0_2, %c0_3, %c0_4] : memref<2x8x32xf32, #tpu.memory_space<vmem>>, vector<2x8x32xf32>
    %cst_5 = arith.constant dense<0.000000e+00> : vector<2x8x8xf32>
    %4 = tpu.matmul %2, %3, %cst_5 {dimension_numbers = #tpu.dot_dimension_numbers<[2], [2], [1], [1], [0, 0, 0, 1, 1, 1], [0], [0]>} : vector<2x8x32xf32>, vector<2x8x32xf32>, vector<2x8x8xf32> -> vector<2x8x8xf32>
    %c0_6 = arith.constant 0 : index
    %c0_7 = arith.constant 0 : index
    %c0_8 = arith.constant 0 : index
    %5 = vector.load %arg2[%c0_6, %c0_7, %c0_8] : memref<2x1x1xi32, #tpu.memory_space<vmem>>, vector<2x1x1xi32>
    %6 = tpu.iota {dimensions = array<i32: 1>} : vector<2x8x8xi32>
    %c8_i32 = arith.constant 8 : i32
    %7 = arith.muli %arg1, %c8_i32 : i32
    %8 = vector.broadcast %7 : i32 to vector<2x8x8xi32>
    %9 = arith.addi %6, %8 : vector<2x8x8xi32>
    %10 = vector.broadcast %5 : vector<2x1x1xi32> to vector<2x8x8xi32>
    %11 = arith.cmpi slt, %9, %10 : vector<2x8x8xi32>
    %cst_9 = arith.constant -1.000000e+06 : f32
    %12 = vector.broadcast %cst_9 : f32 to vector<2x8x8xf32>
    %13 = arith.select %11, %4, %12 : vector<2x8x8xi1>, vector<2x8x8xf32>
    %cst_10 = arith.constant dense<0xFF800000> : vector<2x8xf32>
    %14 = vector.multi_reduction <maximumf>, %13, %cst_10 [2] : vector<2x8x8xf32> to vector<2x8xf32>
    %15 = vector.shape_cast %14 : vector<2x8xf32> to vector<2x8x1xf32>
    %16 = vector.broadcast %15 : vector<2x8x1xf32> to vector<2x8x8xf32>
    %17 = arith.subf %13, %16 : vector<2x8x8xf32>
    %18 = math.exp %17 : vector<2x8x8xf32>
    %cst_11 = arith.constant dense<0.000000e+00> : vector<2x8xf32>
    %19 = vector.multi_reduction <add>, %18, %cst_11 [2] : vector<2x8x8xf32> to vector<2x8xf32>
    %20 = vector.shape_cast %19 : vector<2x8xf32> to vector<2x8x1xf32>
    %21 = tpu.reciprocal %20 : vector<2x8x1xf32> -> vector<2x8x1xf32>
    %22 = vector.broadcast %21 : vector<2x8x1xf32> to vector<2x8x8xf32>
    %23 = arith.mulf %18, %22 : vector<2x8x8xf32>
    %c0_12 = arith.constant 0 : index
    %c0_13 = arith.constant 0 : index
    %c0_14 = arith.constant 0 : index
    %24 = vector.load %arg7[%c0_12, %c0_13, %c0_14] : memref<2x8x8xf32, #tpu.memory_space<vmem>>, vector<2x8x8xf32>
    tpu.vector_store %arg7[%c0_12, %c0_13, %c0_14], %23 {strides = array<i32>} : memref<2x8x8xf32, #tpu.memory_space<vmem>>, vector<2x8x8xf32>,
    %c0_15 = arith.constant 0 : index
    %c0_16 = arith.constant 0 : index
    %c0_17 = arith.constant 0 : index
    %25 = vector.load %arg5[%c0_15, %c0_16, %c0_17] : memref<2x8x32xf32, #tpu.memory_space<vmem>>, vector<2x8x32xf32>
    %cst_18 = arith.constant dense<0.000000e+00> : vector<2x8x32xf32>
    %26 = tpu.matmul %23, %25, %cst_18 {dimension_numbers = #tpu.dot_dimension_numbers<[2], [1], [1], [2], [0, 0, 0, 1, 1, 2], [0], [0]>} : vector<2x8x8xf32>, vector<2x8x32xf32>, vector<2x8x32xf32> -> vector<2x8x32xf32>
    %c0_19 = arith.constant 0 : index
    %c0_20 = arith.constant 0 : index
    %c0_21 = arith.constant 0 : index
    %27 = vector.load %arg6[%c0_19, %c0_20, %c0_21] : memref<2x8x32xf32, #tpu.memory_space<vmem>>, vector<2x8x32xf32>
    tpu.vector_store %arg6[%c0_19, %c0_20, %c0_21], %26 {strides = array<i32>} : memref<2x8x32xf32, #tpu.memory_space<vmem>>, vector<2x8x32xf32>,
    return
  }
  func.func @transform_0(%arg0: i32, %arg1: i32) -> (i32, i32, i32) {
    %c0_i32 = arith.constant 0 : i32
    %c0_i32_0 = arith.constant 0 : i32
    %c0_i32_1 = arith.constant 0 : i32
    return %arg0, %c0_i32, %c0_i32_0 : i32, i32, i32
  }
  func.func @transform_1(%arg0: i32, %arg1: i32) -> (i32, i32, i32) {
    %c0_i32 = arith.constant 0 : i32
    %c0_i32_0 = arith.constant 0 : i32
    return %arg0, %arg1, %c0_i32 : i32, i32, i32
  }
  func.func @transform_2(%arg0: i32, %arg1: i32) -> (i32, i32, i32) {
    %c0_i32 = arith.constant 0 : i32
    %c0_i32_0 = arith.constant 0 : i32
    %c0_i32_1 = arith.constant 0 : i32
    return %arg0, %c0_i32, %c0_i32_0 : i32, i32, i32
  }
  func.func @transform_3(%arg0: i32, %arg1: i32) -> (i32, i32, i32) {
    %c0_i32 = arith.constant 0 : i32
    %c0_i32_0 = arith.constant 0 : i32
    %c0_i32_1 = arith.constant 0 : i32
    return %arg0, %c0_i32, %c0_i32_0 : i32, i32, i32
  }
  func.func @transform_4(%arg0: i32, %arg1: i32) -> (i32, i32, i32) {
    %c0_i32 = arith.constant 0 : i32
    %c0_i32_0 = arith.constant 0 : i32
    return %arg0, %arg1, %c0_i32 : i32, i32, i32
  }
  func.func @transform_5(%arg0: i32, %arg1: i32) -> (i32, i32, i32) {
    %c0_i32 = arith.constant 0 : i32
    %c0_i32_0 = arith.constant 0 : i32
    return %arg0, %arg1, %c0_i32 : i32, i32, i32
  }
}

</mosaic_0001>

<bundles_post_ra>
// kernel: dot_product_attention.1
= control target key start
LH: loop header
LB: loop body
LE: loop exit
PB: predicated region body
PF: predicated region fallthrough
CT: control target
= control target key end

     0   :  { %11 = vsyncpa [#allocation3], 0  ;;  %s526_s0 = inlined_call_operand.vmem [shape: s32[2,1,1], index: 0, kind: input, shape index: {}]   ;;  %s527_s1 = inlined_call_operand.hbm [shape: f32[2,8,32], index: 1, kind: input, shape index: {}]   ;;  %s528_s2 = inlined_call_operand.hbm [shape: f32[2,8,32], index: 2, kind: input, shape index: {}]   ;;  %s529_s3 = inlined_call_operand.hbm [shape: f32[2,8,32], index: 3, kind: input, shape index: {}]   ;;  %s530_s4 = inlined_call_operand.hbm [shape: f32[2,8,32], index: 4, kind: output, shape index: {0}]   ;;  %s531_s5 = inlined_call_operand.hbm [shape: f32[2,8,8], index: 5, kind: output, shape index: {1}]  }
   0x1   :  { %12 = vsyncpa [#allocation6], 0 }
   0x2   :  { %13 = vsyncpa [#allocation4], 0 }
   0x3   :  { %14 = vsyncpa [#allocation10], 0  ;;  %s34_s20 = sshll.u32 %s528_s2, 4  ;;  %s438_s21 = smov [#allocation5]   ;;  %s35_s20 = int_to_ptr.hbm [resolvable:$true] %s34_s20 }
   0x4   :  { %s36_s22 = sshll.u32 %s438_s21, 4  ;;  %s21_s25 = sshll.u32 %s527_s1, 4  ;;  %s37_s22 = int_to_ptr.vmem [resolvable:$true] %s36_s22  ;;  %s22_s25 = int_to_ptr.hbm [resolvable:$true] %s21_s25 }
   0x5   :  { %s439_s26 = smov 128   ;;  %s440_s27 = smov 8  }
   0x6   :  { %42 = dma.hbm_to_vmem [thread:$0]  %s35_s20, 256, %s37_s22, [#allocation6], %s439_s26, %s439_s26, %s440_s27  }
   0x7   :  { %s441_s28 = smov [#allocation2]   ;;  %s47_s2 = sshll.u32 %s529_s3, 4  ;;  %s48_s2 = int_to_ptr.hbm [resolvable:$true] %s47_s2 }
   0x8   :  { %s23_s29 = sshll.u32 %s441_s28, 4  ;;  %s442_s1 = smov [#allocation7]   ;;  %s24_s29 = int_to_ptr.vmem [resolvable:$true] %s23_s29 }
   0x9   :  { %29 = dma.hbm_to_vmem [thread:$0]  %s22_s25, 256, %s24_s29, [#allocation3], %s439_s26, %s439_s26, %s440_s27  }
   0xa   :  { %s49_s7 = sshll.u32 %s442_s1, 4  ;;  %s50_s7 = int_to_ptr.vmem [resolvable:$true] %s49_s7 }
   0xb   :  { %55 = dma.hbm_to_vmem [thread:$0]  %s48_s2, 256, %s50_s7, [#allocation6], %s439_s26, %s439_s26, %s440_s27  }
   0xc   :  { %430 = dma.done.wait [#allocation3], 256  }
   0xd   :  { %431 = vsyncadd [#allocation3], 4294967040 }
   0xe   :  { %432 = dma.done.wait [#allocation6], 512  }
   0xf   :  { %433 = vsyncadd [#allocation6], 4294966784  ;;  %v443_v0 = vmov 0   ;;  %vm74_vm0 = vcmask 261120   ;;  %v72_v1 = vld [vmem:[#allocation5] sm:$0xff]  ;;  %v73_v2 = vld [vmem:[#allocation5 + $0x8] sm:$0xff]  ;;  %v129_v9 = vlaneseq }
  0x10   :  { %299 = vset.pattern.permute.xlu0 %v443_v0  ;;  %v68_v3 = vld [vmem:[#allocation2] sm:$0xff]  ;;  %285 = vmatpush.xpose.msk.msra.mxu0 %vm74_vm0, %v72_v1  ;;  %v69_v5 = vld [vmem:[#allocation2 + $0x8] sm:$0xff]  ;;  %vm146_vm2 = vcmask 64512   ;;  %s266_s14 = sshll.u32 %s531_s5, 4  ;;  %s445_s15 = smov [#allocation8]   ;;  %s267_s14 = int_to_ptr.hbm [resolvable:$true] %s266_s14 }
  0x11   :  { %287 = vmatpush.xpose.msk.msra.mxu1 %vm74_vm0, %v73_v2  ;;  %v70_v4 = vmul.f32 0.17677669, %v68_v3  ;;  %v71_v6 = vmul.f32 0.17677669, %v69_v5  ;;  %v300_v7 = vld [vmem:[%s526_s0] ss:$0 sm:$0xff] }
  0x12   :  { %137 = vperm.xlu0 %299, %v300_v7   ;;  %v301_v8 = vld [vmem:[%s526_s0 + $0x1] ss:$0 sm:$0xff]  ;;  %v130_v11 = vshrl.u32 %v129_v9, 7  ;;  %v198_v30 = vld [vmem:[#allocation7 + $0x8] sm:$0xff]  ;;  %s444_s0 = smov [#allocation9]   ;;  %s251_s16 = sshll.u32 %s445_s15, 4  ;;  %s252_s16 = int_to_ptr.vmem [resolvable:$true] %s251_s16 }
  0x13   :  { %286 = vmatmul.msk.f32.vlgmr.msra.gmra.mxu0 %vm74_vm0, %v70_v4  ;;  %v197_v29 = vld [vmem:[#allocation7] sm:$0xff]  ;;  %240 = vmatpush.msra.mxu3 %v198_v30  ;;  %s264_s11 = sshll.u32 %s444_s0, 4  ;;  %s253_s19 = sshll.u32 %s530_s4, 4  ;;  %s265_s11 = int_to_ptr.vmem [resolvable:$true] %s264_s11  ;;  %s254_s19 = int_to_ptr.hbm [resolvable:$true] %s253_s19 }
  0x14   :  { %288 = vmatmul.msk.f32.vlgmr.msra.gmra.mxu1 %vm74_vm0, %v71_v6  ;;  %217 = vmatpush.msra.mxu2 %v197_v29 }
  0x1a   :  { %140 = vperm.xlu0 %299, %v301_v8  }
  0x84   :  { %v138_v10 = vpop.permute.xlu0 %137 }
  0x85   :  { %vm142_vm1 = vcmp.lt.s32.totalorder %v130_v11, %v138_v10 }
  0x8c   :  { %v141_v13 = vpop.permute.xlu0 %140 }
  0x8d   :  { %vm143_vm3 = vcmp.lt.s32.totalorder %v130_v11, %v141_v13 }
  0x90   :  { %v98_v12 = vpop.f32.mrf.mxu0 }
  0x91   :  { %v144_v14 = vsel %vm142_vm1, %v98_v12, -1000000.0  ;;  %v124_v16 = vpop.f32.mrf.mxu1 }
  0x92   :  { %v147_v15 = vsel %vm146_vm2, %v144_v14, -inf  ;;  %v145_v17 = vsel %vm143_vm3, %v124_v16, -1000000.0 }
  0x93   :  { %148 = vmax.xlane.f32.xlu1 %v147_v15  ;;  %v150_v18 = vsel %vm146_vm2, %v145_v17, -inf }
  0x9b   :  { %151 = vmax.xlane.f32.xlu1 %v150_v18 }
 0x106   :  { %v149_v19 = vpop.xlane.xlu1 %148 }
 0x107   :  { %v153_v20 = vsub.f32 %v144_v14, %v149_v19 }
 0x109   :  { %v155_v21 = vmul.f32 1.442695, %v153_v20 }
 0x10b   :  { %302 = vpow2.f32 %v155_v21 }
 0x10e   :  { %v152_v22 = vpop.xlane.xlu1 %151 }
 0x10f   :  { %v154_v23 = vsub.f32 %v145_v17, %v152_v22 }
 0x111   :  { %v303_v24 = vpop.eup %302  ;;  %v157_v25 = vmul.f32 1.442695, %v154_v23 }
 0x112   :  { %v159_v26 = vsel %vm146_vm2, %v303_v24, 0.0 }
 0x113   :  { %304 = vpow2.f32 %v157_v25  ;;  %160 = vadd.xlane.f32.xlu2 %v159_v26 }
 0x119   :  { %v305_v27 = vpop.eup %304 }
 0x11a   :  { %v162_v28 = vsel %vm146_vm2, %v305_v27, 0.0 }
 0x11b   :  { %163 = vadd.xlane.f32.xlu2 %v162_v28 }
 0x186   :  { %v161_v31 = vpop.xlane.xlu2 %160 }
 0x187   :  { %306 = vrcp.f32 %v161_v31  ;;  %v176_v36 = vand.u32 2147483648, %v161_v31  ;;  %v174_v38 = vand.u32 2147483647, %v161_v31  ;;  %vm170_vm5 = vweird.f32 %v161_v31 }
 0x189   :  { %v177_v41 = vor.u32 1.1754944e-38, %v176_v36  ;;  %vm175_vm7 = vcmp.eq.f32.partialorder %v174_v38, 8.507059e+37 }
 0x18d   :  { %v307_v32 = vpop.eup %306 }
 0x18e   :  { %v166_v33 = vmul.f32 %v307_v32, %v161_v31  ;;  %v164_v34 = vpop.xlane.xlu2 %163  ;;  %vm171_vm4 = vweird.f32 %v307_v32 }
 0x18f   :  { %308 = vrcp.f32 %v164_v34  ;;  %vm172_vm6 = vmor %vm170_vm5, %vm171_vm4  ;;  %v190_v47 = vand.u32 2147483648, %v164_v34  ;;  %v188_v49 = vand.u32 2147483647, %v164_v34  ;;  %vm184_vm9 = vweird.f32 %v164_v34 }
 0x190   :  { %v167_v35 = vsub.f32 1.0, %v166_v33 }
 0x191   :  { %v191_v51 = vor.u32 1.1754944e-38, %v190_v47  ;;  %vm189_vm11 = vcmp.eq.f32.partialorder %v188_v49, 8.507059e+37 }
 0x192   :  { %v168_v37 = vmul.f32 %v307_v32, %v167_v35 }
 0x194   :  { %v169_v39 = vadd.f32 %v307_v32, %v168_v37 }
 0x195   :  { %v309_v40 = vpop.eup %308 }
 0x196   :  { %v180_v42 = vmul.f32 %v309_v40, %v164_v34  ;;  %v173_v43 = vsel %vm172_vm6, %v307_v32, %v169_v39  ;;  %vm185_vm8 = vweird.f32 %v309_v40 }
 0x197   :  { %v178_v44 = vsel %vm175_vm7, %v177_v41, %v173_v43  ;;  %vm186_vm10 = vmor %vm184_vm9, %vm185_vm8 }
 0x198   :  { %v181_v45 = vsub.f32 1.0, %v180_v42  ;;  %v193_v46 = vmul.f32 %v303_v24, %v178_v44 }
 0x19a   :  { %v182_v48 = vmul.f32 %v309_v40, %v181_v45  ;;  %289 = vmatmul.msk.f32.vlgmr.msra.gmra.mxu2 %vm146_vm2, %v193_v46  ;;  %195 = vst.msk [vmem:[#allocation9] sm:$0xff] %vm146_vm2, %v193_v46 }
 0x19c   :  { %v183_v50 = vadd.f32 %v309_v40, %v182_v48 }
 0x19e   :  { %v187_v52 = vsel %vm186_vm10, %v309_v40, %v183_v50 }
 0x19f   :  { %v192_v53 = vsel %vm189_vm11, %v191_v51, %v187_v52 }
 0x1a0   :  { %v194_v54 = vmul.f32 %v305_v27, %v192_v53 }
 0x1a2   :  { %290 = vmatmul.msk.f32.vlgmr.msra.gmra.mxu3 %vm146_vm2, %v194_v54  ;;  %196 = vst.msk [vmem:[#allocation9 + $0x8] sm:$0xff] %vm146_vm2, %v194_v54 }
 0x1a3   :  { %272 = dma.vmem_to_hbm [thread:$0]  %s265_s11, 256, %s267_s14, [#allocation10], %s439_s26, %s439_s26, %s440_s27  }
 0x21d   :  { %v219_v55 = vpop.f32.mrf.mxu2 }
 0x21e   :  { %245 = vst.msk [vmem:[#allocation8] sm:$0xff] %vm74_vm0, %v219_v55 }
 0x225   :  { %v242_v56 = vpop.f32.mrf.mxu3 }
 0x226   :  { %246 = vst.msk [vmem:[#allocation8 + $0x8] sm:$0xff] %vm74_vm0, %v242_v56 }
 0x227   :  { %259 = dma.vmem_to_hbm [thread:$0]  %s252_s16, 256, %s254_s19, [#allocation4], %s439_s26, %s439_s26, %s440_s27  }
 0x228   :  { %434 = dma.done.wait [#allocation4], 256  }
 0x229   :  { %435 = vsyncadd [#allocation4], 4294967040 }
 0x22a   :  { %436 = dma.done.wait [#allocation10], 256  }
 0x22b   :  { %437 = vsyncadd [#allocation10], 4294967040 }
 0x22c   :  { %281 = vsyncpa [#allocation3], 1 }
 0x22d   :  { %282 = vsyncpa [#allocation6], 1 }
 0x22e   :  { %283 = vsyncpa [#allocation4], 1 }
 0x22f   :  { %284 = vsyncpa [#allocation10], 1 }

</bundles_post_ra>
